<compile_context>
chip_gen: v7x
topology: tpu7x:2x2x1
jax: 0.10.0
libtpu: 0.0.40
codegen_flags: <defaults>
</compile_context>

<pallas_src>
import jax
import jax.numpy as jnp
from jax.experimental import pallas as pl
from jax.experimental.pallas import tpu as pltpu


def _bignn_kernel(lap_ref, feats_k_ref, feats_row_ref, w_ref, b_ref,
                  out_ref, acc_ref):
    """Grid = (output row tiles, K-reduction tiles over N).

    lap_ref       : (tile_n, tile_k) bf16  -- Laplacian block
    feats_k_ref   : (tile_k, D)      bf16  -- feature rows for this K block
    feats_row_ref : (tile_n, D)      f32   -- feature rows matching output rows
    w_ref         : (2D, O_pad)      f32   -- [W1^T ; W2^T] stacked
    b_ref         : (1, O_pad)       f32   -- b1 + b2 (zero-padded)
    out_ref       : (tile_n, O_pad)  f32
    acc_ref       : (tile_n, D)      f32 VMEM scratch, accumulates x = L @ E
    """
    k = pl.program_id(1)

    @pl.when(k == 0)
    def _init():
        acc_ref[...] = jnp.zeros_like(acc_ref)

    # Partial x = L @ E (bf16 inputs, f32 accumulation on the MXU).
    acc_ref[...] += jnp.dot(lap_ref[...], feats_k_ref[...],
                            preferred_element_type=jnp.float32)

    @pl.when(k == pl.num_programs(1) - 1)
    def _finalize():
        x = acc_ref[...]                       # (tile_n, D) f32
        e = feats_row_ref[...]                 # (tile_n, D) f32
        # Fused Linear stage: [E + x | x ⊙ E] @ [W1^T ; W2^T] + (b1 + b2)
        lhs = jnp.concatenate([e + x, x * e], axis=-1)        # (tile_n, 2D)
        y = jnp.dot(lhs, w_ref[...], preferred_element_type=jnp.float32)
        out_ref[...] = (y + b_ref[...]).astype(out_ref.dtype)


def _round_up(x, m):
    return ((x + m - 1) // m) * m


def _choose_tiles(n):
    """Return (n_pad, tile_n, tile_k) with n_pad % tile_n == 0, n_pad % tile_k == 0,
    tile_n % 16 == 0 (bf16 sublane packing), tile_k % 128 == 0 (lane width)."""
    if n <= 256:
        n_pad = _round_up(n, 128)          # 128 or 256
        return n_pad, n_pad, n_pad
    n_pad = _round_up(n, 512)
    return n_pad, 256, 512


def bignn_layer(lap, feats, w1, b1, w2, b2, *, tile_n=None, tile_k=None):
    """Pallas BiGNNLayer forward.

    lap   : (N, N) float32
    feats : (N, D) float32
    w1,w2 : (O, D) float32  (PyTorch Linear weight layout)
    b1,b2 : (O,)   float32
    returns (N, O) float32
    """
    N, D = feats.shape
    O = w1.shape[0]

    n_pad_auto, tn_auto, tk_auto = _choose_tiles(N)
    if tile_n is None:
        tile_n = tn_auto
    if tile_k is None:
        tile_k = tk_auto
    assert tile_n % 16 == 0, "tile_n must be a multiple of 16 (bf16 sublanes)"
    assert tile_k % 128 == 0, "tile_k must be a multiple of 128 (lanes)"

    # Pad N so both tile sizes divide it; zero rows/cols contribute nothing.
    N_pad = _round_up(max(N, n_pad_auto), tile_n)
    N_pad = _round_up(N_pad, tile_k)

    # Lane-dense output: pad out_dim up to a multiple of 128 lanes.
    O_pad = _round_up(O, 128)

    # Fused weights / bias (tiny, grid-invariant, kept in f32).
    w_cat = jnp.concatenate([w1.T, w2.T], axis=0)            # (2D, O)
    w_cat = jnp.pad(w_cat, ((0, 0), (0, O_pad - O)))         # (2D, O_pad)
    b_sum = jnp.pad((b1 + b2).reshape(1, O), ((0, 0), (0, O_pad - O)))

    # bf16 copies feed the memory-bound L @ E stream; the elementwise stage
    # reads the matching rows in full f32 via a separate row-tiled spec.
    lap_bf16 = lap.astype(jnp.bfloat16)
    feats_bf16 = feats.astype(jnp.bfloat16)
    feats_f32 = feats

    if N_pad != N:
        pad_n = N_pad - N
        lap_bf16 = jnp.pad(lap_bf16, ((0, pad_n), (0, pad_n)))
        feats_bf16 = jnp.pad(feats_bf16, ((0, pad_n), (0, 0)))
        feats_f32 = jnp.pad(feats_f32, ((0, pad_n), (0, 0)))

    grid = (N_pad // tile_n, N_pad // tile_k)

    out_padded = pl.pallas_call(
        _bignn_kernel,
        out_shape=jax.ShapeDtypeStruct((N_pad, O_pad), feats.dtype),
        grid_spec=pltpu.PrefetchScalarGridSpec(
            num_scalar_prefetch=0,
            grid=grid,
            in_specs=[
                # (If profiling shows exposed DMA on the lap stream, add
                #  pipeline_mode=pl.Buffered(3) here where VMEM headroom allows.)
                pl.BlockSpec((tile_n, tile_k), lambda i, k: (i, k)),   # lap
                pl.BlockSpec((tile_k, D), lambda i, k: (k, 0)),        # E (K blk)
                pl.BlockSpec((tile_n, D), lambda i, k: (i, 0)),        # E (rows)
                pl.BlockSpec((2 * D, O_pad), lambda i, k: (0, 0)),     # [W1^T;W2^T]
                pl.BlockSpec((1, O_pad), lambda i, k: (0, 0)),         # b1+b2
            ],
            out_specs=pl.BlockSpec((tile_n, O_pad), lambda i, k: (i, 0)),
            scratch_shapes=[pltpu.VMEM((tile_n, D), jnp.float32)],
        ),
        compiler_params=pltpu.CompilerParams(
            dimension_semantics=("parallel", "arbitrary"),
            vmem_limit_bytes=64 * 1024 * 1024,
        ),
    )(lap_bf16, feats_bf16, feats_f32, w_cat, b_sum)

    return out_padded[:N, :O]


def bignn_layer_ref(lap, feats, w1, b1, w2, b2):
    x = lap @ feats
    part1 = (feats + x) @ w1.T + b1
    part2 = (x * feats) @ w2.T + b2
    return part1 + part2


if __name__ == "__main__":
    N, in_dim, out_dim = 128, 32, 32

    key = jax.random.PRNGKey(0)
    k_lap, k_feat, k_w1, k_b1, k_w2, k_b2 = jax.random.split(key, 6)

    lap = jax.random.normal(k_lap, (N, N), dtype=jnp.float32) * 0.1
    feats = jax.random.normal(k_feat, (N, in_dim), dtype=jnp.float32)

    # Deterministic parameter init (mimics PyTorch Linear's uniform init range).
    bound = 1.0 / (in_dim ** 0.5)
    w1 = jax.random.uniform(k_w1, (out_dim, in_dim), jnp.float32, -bound, bound)
    b1 = jax.random.uniform(k_b1, (out_dim,), jnp.float32, -bound, bound)
    w2 = jax.random.uniform(k_w2, (out_dim, in_dim), jnp.float32, -bound, bound)
    b2 = jax.random.uniform(k_b2, (out_dim,), jnp.float32, -bound, bound)

    out = bignn_layer(lap, feats, w1, b1, w2, b2)
    out = jax.block_until_ready(out)
    assert out.shape == (N, out_dim)

    # Mixed-precision reference mirroring the kernel's bf16 L @ E stage.
    x_mp = jnp.dot(lap.astype(jnp.bfloat16), feats.astype(jnp.bfloat16),
                   preferred_element_type=jnp.float32)
    ref_mp = ((feats + x_mp) @ w1.T + b1) + ((x_mp * feats) @ w2.T + b2)
    assert jnp.allclose(out, ref_mp, atol=2e-2, rtol=2e-2), \
        "mismatch vs bf16-matched reference"

    # Full-f32 reference (PyTorch semantics); looser tolerance accounts for the
    # bf16 Laplacian stream used by the kernel.
    ref_f32 = bignn_layer_ref(lap, feats, w1, b1, w2, b2)
    assert jnp.allclose(out, ref_f32, atol=5e-2, rtol=5e-2), \
        "mismatch vs f32 reference"

    print("KERNEL_OK")
</pallas_src>

<mosaic_0001>
module attributes {stable_mosaic.version = 11 : i64} {
  func.func @_bignn_kernel(%arg0: i32, %arg1: i32, %arg2: memref<128x128xbf16, #tpu.memory_space<vmem>>, %arg3: memref<128x32xbf16, #tpu.memory_space<vmem>>, %arg4: memref<128x32xf32, #tpu.memory_space<vmem>>, %arg5: memref<64x128xf32, #tpu.memory_space<vmem>>, %arg6: memref<1x128xf32, #tpu.memory_space<vmem>>, %arg7: memref<128x128xf32, #tpu.memory_space<vmem>>, %arg8: memref<128x32xf32, #tpu.memory_space<vmem>>) attributes {dimension_semantics = [#tpu.dimension_semantics<parallel>, #tpu.dimension_semantics<arbitrary>], iteration_bounds = array<i64: 1, 1>, scalar_prefetch = 0 : i64, scratch_operands = 1 : i64, tpu.core_type = #tpu.core_type<tc>, window_params = [{transform_indices = @transform_0, window_bounds = array<i64: 128, 128>}, {transform_indices = @transform_1, window_bounds = array<i64: 128, 32>}, {transform_indices = @transform_2, window_bounds = array<i64: 128, 32>}, {pipeline_mode = #tpu.pipeline_mode<synchronous>, transform_indices = @transform_3, window_bounds = array<i64: 64, 128>}, {pipeline_mode = #tpu.pipeline_mode<synchronous>, transform_indices = @transform_4, window_bounds = array<i64: 1, 128>}, {transform_indices = @transform_5, window_bounds = array<i64: 128, 128>}]} {
    %c0_i32 = arith.constant 0 : i32
    %0 = arith.cmpi eq, %arg1, %c0_i32 : i32
    %1 = arith.extui %0 : i1 to i32
    %c0_i32_0 = arith.constant 0 : i32
    %2 = arith.cmpi ne, %1, %c0_i32_0 : i32
    scf.if %2 {
      %cst_10 = arith.constant 0.000000e+00 : f32
      %12 = vector.broadcast %cst_10 : f32 to vector<128x32xf32>
      %c0_11 = arith.constant 0 : index
      %c0_12 = arith.constant 0 : index
      %13 = vector.load %arg8[%c0_11, %c0_12] : memref<128x32xf32, #tpu.memory_space<vmem>>, vector<128x32xf32>
      tpu.vector_store %arg8[%c0_11, %c0_12], %12 {strides = array<i32>} : memref<128x32xf32, #tpu.memory_space<vmem>>, vector<128x32xf32>,
    } else {
    }
    %c0 = arith.constant 0 : index
    %c0_1 = arith.constant 0 : index
    %3 = vector.load %arg8[%c0, %c0_1] : memref<128x32xf32, #tpu.memory_space<vmem>>, vector<128x32xf32>
    %c0_2 = arith.constant 0 : index
    %c0_3 = arith.constant 0 : index
    %4 = vector.load %arg2[%c0_2, %c0_3] : memref<128x128xbf16, #tpu.memory_space<vmem>>, vector<128x128xbf16>
    %c0_4 = arith.constant 0 : index
    %c0_5 = arith.constant 0 : index
    %5 = vector.load %arg3[%c0_4, %c0_5] : memref<128x32xbf16, #tpu.memory_space<vmem>>, vector<128x32xbf16>
    %cst = arith.constant dense<0.000000e+00> : vector<128x32xf32>
    %6 = tpu.matmul %4, %5, %cst {dimension_numbers = #tpu.dot_dimension_numbers<[1], [0], [0], [1], [0, 0, 1, 1], [], []>} : vector<128x128xbf16>, vector<128x32xbf16>, vector<128x32xf32> -> vector<128x32xf32>
    %7 = arith.addf %3, %6 : vector<128x32xf32>
    %c0_6 = arith.constant 0 : index
    %c0_7 = arith.constant 0 : index
    %8 = vector.load %arg8[%c0_6, %c0_7] : memref<128x32xf32, #tpu.memory_space<vmem>>, vector<128x32xf32>
    tpu.vector_store %arg8[%c0_6, %c0_7], %7 {strides = array<i32>} : memref<128x32xf32, #tpu.memory_space<vmem>>, vector<128x32xf32>,
    %c0_i32_8 = arith.constant 0 : i32
    %9 = arith.cmpi eq, %arg1, %c0_i32_8 : i32
    %10 = arith.extui %9 : i1 to i32
    %c0_i32_9 = arith.constant 0 : i32
    %11 = arith.cmpi ne, %10, %c0_i32_9 : i32
    scf.if %11 {
      %c0_10 = arith.constant 0 : index
      %c0_11 = arith.constant 0 : index
      %12 = vector.load %arg8[%c0_10, %c0_11] : memref<128x32xf32, #tpu.memory_space<vmem>>, vector<128x32xf32>
      %c0_12 = arith.constant 0 : index
      %c0_13 = arith.constant 0 : index
      %13 = vector.load %arg4[%c0_12, %c0_13] : memref<128x32xf32, #tpu.memory_space<vmem>>, vector<128x32xf32>
      %14 = arith.addf %13, %12 : vector<128x32xf32>
      %15 = arith.mulf %12, %13 : vector<128x32xf32>
      %16 = tpu.concatenate %14, %15 in 1 : vector<128x32xf32>, vector<128x32xf32> -> vector<128x64xf32>
      %c0_14 = arith.constant 0 : index
      %c0_15 = arith.constant 0 : index
      %17 = vector.load %arg5[%c0_14, %c0_15] : memref<64x128xf32, #tpu.memory_space<vmem>>, vector<64x128xf32>
      %cst_16 = arith.constant dense<0.000000e+00> : vector<128x128xf32>
      %18 = tpu.matmul %16, %17, %cst_16 {dimension_numbers = #tpu.dot_dimension_numbers<[1], [0], [0], [1], [0, 0, 1, 1], [], []>} : vector<128x64xf32>, vector<64x128xf32>, vector<128x128xf32> -> vector<128x128xf32>
      %c0_17 = arith.constant 0 : index
      %c0_18 = arith.constant 0 : index
      %19 = vector.load %arg6[%c0_17, %c0_18] : memref<1x128xf32, #tpu.memory_space<vmem>>, vector<1x128xf32>
      %20 = vector.broadcast %19 : vector<1x128xf32> to vector<128x128xf32>
      %21 = arith.addf %18, %20 : vector<128x128xf32>
      %c0_19 = arith.constant 0 : index
      %c0_20 = arith.constant 0 : index
      %22 = vector.load %arg7[%c0_19, %c0_20] : memref<128x128xf32, #tpu.memory_space<vmem>>, vector<128x128xf32>
      tpu.vector_store %arg7[%c0_19, %c0_20], %21 {strides = array<i32>} : memref<128x128xf32, #tpu.memory_space<vmem>>, vector<128x128xf32>,
    } else {
    }
    return
  }
  func.func @transform_0(%arg0: i32, %arg1: i32) -> (i32, i32) {
    %c0_i32 = arith.constant 0 : i32
    return %arg0, %arg1 : i32, i32
  }
  func.func @transform_1(%arg0: i32, %arg1: i32) -> (i32, i32) {
    %c0_i32 = arith.constant 0 : i32
    %c0_i32_0 = arith.constant 0 : i32
    return %arg1, %c0_i32 : i32, i32
  }
  func.func @transform_2(%arg0: i32, %arg1: i32) -> (i32, i32) {
    %c0_i32 = arith.constant 0 : i32
    %c0_i32_0 = arith.constant 0 : i32
    return %arg0, %c0_i32 : i32, i32
  }
  func.func @transform_3(%arg0: i32, %arg1: i32) -> (i32, i32) {
    %c0_i32 = arith.constant 0 : i32
    %c0_i32_0 = arith.constant 0 : i32
    %c0_i32_1 = arith.constant 0 : i32
    return %c0_i32, %c0_i32_0 : i32, i32
  }
  func.func @transform_4(%arg0: i32, %arg1: i32) -> (i32, i32) {
    %c0_i32 = arith.constant 0 : i32
    %c0_i32_0 = arith.constant 0 : i32
    %c0_i32_1 = arith.constant 0 : i32
    return %c0_i32, %c0_i32_0 : i32, i32
  }
  func.func @transform_5(%arg0: i32, %arg1: i32) -> (i32, i32) {
    %c0_i32 = arith.constant 0 : i32
    %c0_i32_0 = arith.constant 0 : i32
    return %arg0, %c0_i32 : i32, i32
  }
}

</mosaic_0001>

<bundles_post_ra>
// kernel: tpu_custom_call.1
= control target key start
LH: loop header
LB: loop body
LE: loop exit
PB: predicated region body
PF: predicated region fallthrough
CT: control target
= control target key end

     0   :  { %10 = vsyncpa [#allocation4], 0  ;;  %s1342_s0 = inlined_call_operand.hbm [shape: bf16[128,128], index: 0, kind: input, shape index: {}]   ;;  %s1343_s1 = inlined_call_operand.hbm [shape: bf16[128,32], index: 1, kind: input, shape index: {}]   ;;  %s1344_s2 = inlined_call_operand.hbm [shape: f32[128,32], index: 2, kind: input, shape index: {}]   ;;  %s1345_s3 = inlined_call_operand.hbm [shape: f32[64,128], index: 3, kind: input, shape index: {}]   ;;  %s1346_s4 = inlined_call_operand.hbm [shape: f32[1,128], index: 4, kind: input, shape index: {}]   ;;  %s1347_s5 = inlined_call_operand.hbm [shape: f32[128,128], index: 5, kind: output, shape index: {}]  }
   0x1   :  { %11 = vsyncpa [#allocation7], 0 }
   0x2   :  { %12 = vsyncpa [#allocation10], 0 }
   0x3   :  { %13 = vsyncpa [#allocation5], 0  ;;  %s1103_s18 = smov [#allocation6]   ;;  %s963_s22 = scalar_lea.hbm %s1343_s1, 1024 }
   0x4   :  { %s31_s19 = sshll.u32 %s1103_s18, 4  ;;  %p964_p0 = scmp.ne.s32.totalorder %s1343_s1, %s963_s22  ;;  %s32_s19 = int_to_ptr.vmem [resolvable:$true] %s31_s19 }
   0x5   :  { %p967_p1 = scmp.lt.u32.totalorder %s963_s22, %s1343_s1 }
   0x7   :  { %p969_p2 = pnand %p967_p1, %p964_p0 }
   0x9   :  { %972 = shalt.err (!%p969_p2)
}
   0xa   :  { %s973_s27 = scalar_lea.vmem %s32_s19, 1024  ;;  %p978_p4 = scmp.lt.s32.totalorder %s32_s19, %s32_s19 }
   0xb   :  { %p974_p3 = scmp.ne.s32.totalorder %s32_s19, %s973_s27  ;;  %p979_p5 = scmp.lt.s32.totalorder %s973_s27, %s973_s27 }
   0xd   :  { %p980_p6 = por %p979_p5, %p978_p4 }
   0xf   :  { %p981_p7 = pnand %p980_p6, %p974_p3 }
  0x11   :  { %984 = shalt.err (!%p981_p7)
}
  0x12   :  { %s1104_s28 = smov 64   ;;  %s1105_s29 = smov 4  }
  0x13   :  { %37 = dma.hbm_to_vmem [thread:$0]  %s1343_s1, 1024, %s32_s19, [#allocation7], %s1104_s28, %s1104_s28, %s1105_s29  }
  0x14   :  { %s1106_s7 = smov [#allocation9]   ;;  %s1107_s9 = smov [#allocation3]  }
  0x15   :  { %s55_s8 = sshll.u32 %s1106_s7, 4  ;;  %s19_s10 = sshll.u32 %s1107_s9, 4  ;;  %s56_s8 = int_to_ptr.vmem [resolvable:$true] %s55_s8  ;;  %s20_s10 = int_to_ptr.vmem [resolvable:$true] %s19_s10 }
  0x16   :  { %s985_s13 = scalar_lea.hbm %s1345_s3, 1024 }
  0x17   :  { %p986_p8 = scmp.ne.s32.totalorder %s1345_s3, %s985_s13  ;;  %p989_p9 = scmp.lt.u32.totalorder %s985_s13, %s1345_s3 }
  0x19   :  { %p991_p10 = pnand %p989_p9, %p986_p8 }
  0x1b   :  { %994 = shalt.err (!%p991_p10)
}
  0x1c   :  { %s995_s1 = scalar_lea.vmem %s56_s8, 1024  ;;  %p1000_p12 = scmp.lt.s32.totalorder %s56_s8, %s56_s8 }
  0x1d   :  { %p996_p11 = scmp.ne.s32.totalorder %s56_s8, %s995_s1  ;;  %p1001_p13 = scmp.lt.s32.totalorder %s995_s1, %s995_s1 }
  0x1f   :  { %p1002_p0 = por %p1001_p13, %p1000_p12 }
  0x21   :  { %p1003_p1 = pnand %p1002_p0, %p996_p11 }
  0x23   :  { %1006 = shalt.err (!%p1003_p1)
}
  0x24   :  { %s1108_s18 = smov 128   ;;  %s1109_s19 = smov 8  }
  0x25   :  { %61 = dma.hbm_to_vmem [thread:$0]  %s1345_s3, 1024, %s56_s8, [#allocation10], %s1108_s18, %s1108_s18, %s1109_s19  }
  0x26   :  { %s1007_s24 = scalar_lea.hbm %s1342_s0, 1024 }
  0x27   :  { %p1008_p2 = scmp.ne.s32.totalorder %s1342_s0, %s1007_s24  ;;  %p1011_p3 = scmp.lt.u32.totalorder %s1007_s24, %s1342_s0 }
  0x29   :  { %p1013_p4 = pnand %p1011_p3, %p1008_p2 }
  0x2b   :  { %1016 = shalt.err (!%p1013_p4)
}
  0x2c   :  { %s1017_s6 = scalar_lea.vmem %s20_s10, 1024  ;;  %p1022_p6 = scmp.lt.s32.totalorder %s20_s10, %s20_s10 }
  0x2d   :  { %p1018_p5 = scmp.ne.s32.totalorder %s20_s10, %s1017_s6  ;;  %p1023_p7 = scmp.lt.s32.totalorder %s1017_s6, %s1017_s6 }
  0x2f   :  { %p1024_p8 = por %p1023_p7, %p1022_p6 }
  0x31   :  { %p1025_p9 = pnand %p1024_p8, %p1018_p5 }
  0x33   :  { %1028 = shalt.err (!%p1025_p9)
}
  0x34   :  { %25 = dma.hbm_to_vmem [thread:$0]  %s1342_s0, 1024, %s20_s10, [#allocation4], %s1104_s28, %s1104_s28, %s1105_s29  }
  0x35   :  { %s1110_s8 = smov [#allocation8]   ;;  %s1111_s11 = smov [#allocation11]  }
  0x36   :  { %s43_s9 = sshll.u32 %s1110_s8, 4  ;;  %s68_s12 = sshll.u32 %s1111_s11, 4  ;;  %s44_s9 = int_to_ptr.vmem [resolvable:$true] %s43_s9  ;;  %s69_s12 = int_to_ptr.vmem [resolvable:$true] %s68_s12 }
  0x37   :  { %s1029_s15 = scalar_lea.hbm %s1344_s2, 2048 }
  0x38   :  { %p1030_p10 = scmp.ne.s32.totalorder %s1344_s2, %s1029_s15  ;;  %p1033_p11 = scmp.lt.u32.totalorder %s1029_s15, %s1344_s2 }
  0x3a   :  { %p1035_p12 = pnand %p1033_p11, %p1030_p10 }
  0x3c   :  { %1038 = shalt.err (!%p1035_p12)
}
  0x3d   :  { %s1039_s0 = scalar_lea.vmem %s44_s9, 2048  ;;  %p1044_p0 = scmp.lt.s32.totalorder %s44_s9, %s44_s9 }
  0x3e   :  { %p1040_p13 = scmp.ne.s32.totalorder %s44_s9, %s1039_s0  ;;  %p1045_p1 = scmp.lt.s32.totalorder %s1039_s0, %s1039_s0 }
  0x40   :  { %p1046_p2 = por %p1045_p1, %p1044_p0 }
  0x42   :  { %p1047_p3 = pnand %p1046_p2, %p1040_p13 }
  0x44   :  { %1050 = shalt.err (!%p1047_p3)
}
  0x45   :  { %49 = dma.hbm_to_vmem [thread:$0]  %s1344_s2, 2048, %s44_s9, [#allocation7], %s1108_s18, %s1108_s18, %s1109_s19  }
  0x46   :  { %s1051_s22 = scalar_lea.hbm %s1346_s4, 16 }
  0x47   :  { %p1052_p4 = scmp.ne.s32.totalorder %s1346_s4, %s1051_s22  ;;  %p1055_p5 = scmp.lt.u32.totalorder %s1051_s22, %s1346_s4 }
  0x49   :  { %p1057_p6 = pnand %p1055_p5, %p1052_p4 }
  0x4b   :  { %1060 = shalt.err (!%p1057_p6)
}
  0x4c   :  { %s1061_s27 = scalar_lea.vmem %s69_s12, 16  ;;  %s1065_s30 = scalar_lea.vmem %s69_s12, 32 }
  0x4d   :  { %p1062_p7 = scmp.ne.s32.totalorder %s69_s12, %s1061_s27  ;;  %p1066_p8 = scmp.lt.s32.totalorder %s69_s12, %s69_s12 }
  0x4e   :  { %p1067_p9 = scmp.lt.s32.totalorder %s1065_s30, %s1061_s27 }
  0x50   :  { %p1068_p10 = por %p1067_p9, %p1066_p8 }
  0x52   :  { %p1069_p11 = pnand %p1068_p10, %p1062_p7 }
  0x54   :  { %1072 = shalt.err (!%p1069_p11)
}
  0x55   :  { %71 = dma.hbm_to_vmem [thread:$0]  %s1346_s4, 16, %s69_s12, [#allocation10]  }
  0x56   :  { %1095 = dma.done.wait [#allocation4], 1024  }
  0x57   :  { %1096 = vsyncadd [#allocation4], 4294966272 }
  0x58   :  { %1097 = dma.done.wait [#allocation7], 3072  }
  0x59   :  { %1098 = vsyncadd [#allocation7], 4294964224 }
  0x5a   :  { %1099 = dma.done.wait [#allocation10], 1040  }
  0x5b   :  { %1100 = vsyncadd [#allocation10], 4294966256  ;;  %vm92_vm0 = vcmask 261120   ;;  %v1112_v0 = vmov 0.0   ;;  %v947_v1 = vld [vmem:[#allocation6] sm:$0xff]   ;;  %v948_v2 = vld [vmem:[#allocation6 + $0x8] sm:$0xff]  }
  0x5c   :  { %95 = vst.msk [vmem:[#allocation2 + $0x10] sm:$0xff] %vm92_vm0, %v1112_v0  ;;  %93 = vst.msk [vmem:[#allocation2] sm:$0xff] %vm92_vm0, %v1112_v0  ;;  %847 = vmatprep.subr.bf16.mxu0 %v947_v1  ;;  %v949_v3 = vld [vmem:[#allocation6 + $0x10] sm:$0xff]   ;;  %v950_v4 = vld [vmem:[#allocation6 + $0x18] sm:$0xff]   ;;  %s1113_s4 = smov 32   ;;  %vm545_vm1 = vcmask 523264  }
  0x5d   :  { %94 = vst.msk [vmem:[#allocation2 + $0x8] sm:$0xff] %vm92_vm0, %v1112_v0  ;;  %96 = vst.msk [vmem:[#allocation2 + $0x18] sm:$0xff] %vm92_vm0, %v1112_v0  ;;  %848 = vmatpush3.bf16.msra.mxu0 %v947_v1  ;;  %v955_v5 = vld [vmem:[#allocation3] sm:$0xff]   ;;  %v952_v7 = vld [vmem:[#allocation6 + $0x28] sm:$0xff]   ;;  %s1114_s3 = smov [#allocation12]  }
  0x5e   :  { %97 = vst.msk [vmem:[#allocation2 + $0x20] sm:$0xff] %vm92_vm0, %v1112_v0  ;;  %98 = vst.msk [vmem:[#allocation2 + $0x28] sm:$0xff] %vm92_vm0, %v1112_v0  ;;  %849 = vmatprep.subr.bf16.mxu0 %v948_v2  ;;  %863 = vmatprep.mubr.bf16.mxu0 %v955_v5  ;;  %v951_v6 = vld [vmem:[#allocation6 + $0x20] sm:$0xff]   ;;  %v953_v8 = vld [vmem:[#allocation6 + $0x30] sm:$0xff]   ;;  %s760_s7 = sshll.u32 %s1114_s3, 4  ;;  %s761_s7 = int_to_ptr.vmem [resolvable:$true] %s760_s7 }
  0x5f   :  { %99 = vst.msk [vmem:[#allocation2 + $0x30] sm:$0xff] %vm92_vm0, %v1112_v0  ;;  %100 = vst.msk [vmem:[#allocation2 + $0x38] sm:$0xff] %vm92_vm0, %v1112_v0  ;;  %v954_v9 = vld [vmem:[#allocation6 + $0x38] sm:$0xff]   ;;  %v956_v10 = vld [vmem:[#allocation3 + $0x8] sm:$0xff]   ;;  %s1073_s8 = scalar_lea.vmem %s761_s7, 2048  ;;  %p1078_p13 = scmp.lt.s32.totalorder %s761_s7, %s761_s7 }
  0x60   :  { %101 = vst.msk [vmem:[#allocation2 + $0x40] sm:$0xff] %vm92_vm0, %v1112_v0  ;;  %102 = vst.msk [vmem:[#allocation2 + $0x48] sm:$0xff] %vm92_vm0, %v1112_v0  ;;  %v957_v11 = vld [vmem:[#allocation3 + $0x10] sm:$0xff]   ;;  %v958_v12 = vld [vmem:[#allocation3 + $0x18] sm:$0xff]   ;;  %p1074_p12 = scmp.ne.s32.totalorder %s761_s7, %s1073_s8  ;;  %p1079_p0 = scmp.lt.s32.totalorder %s1073_s8, %s1073_s8 }
  0x61   :  { %103 = vst.msk [vmem:[#allocation2 + $0x50] sm:$0xff] %vm92_vm0, %v1112_v0  ;;  %104 = vst.msk [vmem:[#allocation2 + $0x58] sm:$0xff] %vm92_vm0, %v1112_v0  ;;  %850 = vmatpush3.bf16.msra.mxu0 %v948_v2  ;;  %v959_v13 = vld [vmem:[#allocation3 + $0x20] sm:$0xff]   ;;  %v960_v14 = vld [vmem:[#allocation3 + $0x28] sm:$0xff]  }
  0x62   :  { %105 = vst.msk [vmem:[#allocation2 + $0x60] sm:$0xff] %vm92_vm0, %v1112_v0  ;;  %106 = vst.msk [vmem:[#allocation2 + $0x68] sm:$0xff] %vm92_vm0, %v1112_v0  ;;  %851 = vmatprep.subr.bf16.mxu0 %v949_v3  ;;  %v961_v15 = vld [vmem:[#allocation3 + $0x30] sm:$0xff]   ;;  %v962_v16 = vld [vmem:[#allocation3 + $0x38] sm:$0xff]   ;;  %p1080_p1 = por %p1079_p0, %p1078_p13 }
  0x63   :  { %107 = vst.msk [vmem:[#allocation2 + $0x70] sm:$0xff] %vm92_vm0, %v1112_v0  ;;  %108 = vst.msk [vmem:[#allocation2 + $0x78] sm:$0xff] %vm92_vm0, %v1112_v0  ;;  %v530_v17 = vld [vmem:[#allocation9] sm:$0xff]  ;;  %v531_v18 = vld [vmem:[#allocation9 + $0x8] sm:$0xff] }
  0x64   :  { %v532_v19 = vld [vmem:[#allocation9 + $0x10] sm:$0xff]  ;;  %v919_v20 = vpack.c.bf16 %v531_v18, %v530_v17  ;;  %v533_v21 = vld [vmem:[#allocation9 + $0x18] sm:$0xff]  ;;  %v534_v23 = vld [vmem:[#allocation9 + $0x20] sm:$0xff]  ;;  %p1081_p2 = pnand %p1080_p1, %p1074_p12 }
  0x65   :  { %852 = vmatpush3.bf16.msra.mxu0 %v949_v3  ;;  %v923_v22 = vpack.c.bf16 %v533_v21, %v532_v19  ;;  %v535_v24 = vld [vmem:[#allocation9 + $0x28] sm:$0xff]  ;;  %v111_v26 = vld [vmem:[#allocation2 + $0x10] sm:$0xff]  ;;  %v109_v27 = vld [vmem:[#allocation2] sm:$0xff] }
  0x66   :  { %853 = vmatprep.subr.bf16.mxu0 %v950_v4  ;;  %920 = vmatprep.subr.bf16.mxu1 %v919_v20  ;;  %v927_v25 = vpack.c.bf16 %v535_v24, %v534_v23  ;;  %v536_v28 = vld [vmem:[#allocation9 + $0x30] sm:$0xff]  ;;  %v537_v29 = vld [vmem:[#allocation9 + $0x38] sm:$0xff]  ;;  %v110_v35 = vld [vmem:[#allocation2 + $0x8] sm:$0xff] }
  0x67   :  { %922 = vmatpush3.bf16.msra.mxu1 %v919_v20  ;;  %v112_v31 = vld [vmem:[#allocation2 + $0x18] sm:$0xff]  ;;  %v931_v32 = vpack.c.bf16 %v537_v29, %v536_v28  ;;  %v115_v41 = vld [vmem:[#allocation2 + $0x30] sm:$0xff]  ;;  %v113_v42 = vld [vmem:[#allocation2 + $0x20] sm:$0xff] }
  0x68   :  { %924 = vmatprep.subr.bf16.mxu1 %v923_v22  ;;  %v116_v44 = vld [vmem:[#allocation2 + $0x38] sm:$0xff]  ;;  %v404_v45 = vld [vmem:[#allocation8 + $0x10] sm:$0xff]  ;;  %v114_v48 = vld [vmem:[#allocation2 + $0x28] sm:$0xff] }
  0x69   :  { %854 = vmatpush3.bf16.msra.mxu0 %v950_v4  ;;  %v402_v49 = vld [vmem:[#allocation8] sm:$0xff]  ;;  %v405_v53 = vld [vmem:[#allocation8 + $0x18] sm:$0xff]  ;;  %v403_v59 = vld [vmem:[#allocation8 + $0x8] sm:$0xff] }
  0x6a   :  { %855 = vmatprep.subr.bf16.mxu0 %v951_v6  ;;  %v119_v2 = vld [vmem:[#allocation2 + $0x50] sm:$0xff]  ;;  %v117_v4 = vld [vmem:[#allocation2 + $0x40] sm:$0xff]  ;;  %v409_v17 = vld [vmem:[#allocation8 + $0x38] sm:$0xff] }
  0x6b   :  { %926 = vmatpush3.bf16.msra.mxu1 %v923_v22  ;;  %v407_v21 = vld [vmem:[#allocation8 + $0x28] sm:$0xff]  ;;  %v123_v29 = vld [vmem:[#allocation2 + $0x70] sm:$0xff] }
  0x6c   :  { %928 = vmatprep.subr.bf16.mxu1 %v927_v25 }
  0x6d   :  { %856 = vmatpush3.bf16.msra.mxu0 %v951_v6 }
  0x6e   :  { %857 = vmatprep.subr.bf16.mxu0 %v952_v7 }
  0x6f   :  { %930 = vmatpush3.bf16.msra.mxu1 %v927_v25 }
  0x70   :  { %932 = vmatprep.subr.bf16.mxu1 %v931_v32 }
  0x71   :  { %858 = vmatpush3.bf16.msra.mxu0 %v952_v7  ;;  %v120_v7 = vld [vmem:[#allocation2 + $0x58] sm:$0xff] }
  0x72   :  { %859 = vmatprep.subr.bf16.mxu0 %v953_v8 }
  0x73   :  { %934 = vmatpush3.bf16.msra.mxu1 %v931_v32  ;;  %v121_v32 = vld [vmem:[#allocation2 + $0x60] sm:$0xff] }
  0x75   :  { %860 = vmatpush3.bf16.msra.mxu0 %v953_v8 }
  0x76   :  { %861 = vmatprep.subr.bf16.mxu0 %v954_v9 }
  0x79   :  { %862 = vmatpush3.bf16.msra.mxu0 %v954_v9  ;;  %v408_v9 = vld [vmem:[#allocation8 + $0x30] sm:$0xff] }
  0x7c   :  { %864 = vmatmul.mubr.bf16.vlgmr.msra.gmra.mrb[0].mxu0 %v956_v10 }
  0x7d   :  { %867 = vmatprep.mubr.bf16.mxu0 %v957_v11 }
  0x84   :  { %868 = vmatmul.mubr.bf16.gmra.mrb[4].mxu0 %v958_v12  ;;  %v118_v12 = vld [vmem:[#allocation2 + $0x48] sm:$0xff] }
  0x85   :  { %871 = vmatprep.mubr.bf16.mxu0 %v959_v13  ;;  %v406_v13 = vld [vmem:[#allocation8 + $0x20] sm:$0xff] }
  0x8c   :  { %872 = vmatmul.mubr.bf16.gmra.mrb[8].mxu0 %v960_v14 }
  0x8d   :  { %875 = vmatprep.mubr.bf16.mxu0 %v961_v15 }
  0x94   :  { %876 = vmatmul.mubr.bf16.gmra.mrb[12].mxu0 %v962_v16 }
 0x14f   :  { %v865_v30 = vpop.f32.mrb[0].mxu0 }
 0x150   :  { %v352_v33 = vadd.f32 %v865_v30, %v111_v26  ;;  %v287_v34 = vpop.f32.mrb[1].mxu0 }
 0x151   :  { %v350_v36 = vadd.f32 %v287_v34, %v109_v27  ;;  %v866_v37 = vpop.f32.mrb[2].mxu0  ;;  %v124_v34 = vld [vmem:[#allocation2 + $0x78] sm:$0xff] }
 0x152   :  { %369 = vst.msk [vmem:[#allocation2 + $0x10] sm:$0xff] %vm92_vm0, %v352_v33  ;;  %v353_v38 = vadd.f32 %v866_v37, %v112_v31  ;;  %v290_v39 = vpop.f32.mrb[3].mxu0 }
 0x153   :  { %367 = vst.msk [vmem:[#allocation2] sm:$0xff] %vm92_vm0, %v350_v36  ;;  %v351_v40 = vadd.f32 %v290_v39, %v110_v35  ;;  %v412_v36 = vld [vmem:[#allocation8 + $0x50] sm:$0xff]  ;;  %v122_v39 = vld [vmem:[#allocation2 + $0x68] sm:$0xff] }
 0x154   :  { %370 = vst.msk [vmem:[#allocation2 + $0x18] sm:$0xff] %vm92_vm0, %v353_v38 }
 0x155   :  { %368 = vst.msk [vmem:[#allocation2 + $0x8] sm:$0xff] %vm92_vm0, %v351_v40  ;;  %v410_v40 = vld [vmem:[#allocation8 + $0x40] sm:$0xff] }
 0x157   :  { %v869_v43 = vpop.f32.mrb[4].mxu0 }
 0x158   :  { %v356_v46 = vadd.f32 %v869_v43, %v115_v41  ;;  %v303_v47 = vpop.f32.mrb[5].mxu0 }
 0x159   :  { %v354_v50 = vadd.f32 %v303_v47, %v113_v42  ;;  %v870_v51 = vpop.f32.mrb[6].mxu0  ;;  %v388_v52 = vld [vmem:[#allocation2 + $0x10] sm:$0xff] }
 0x15a   :  { %373 = vst.msk [vmem:[#allocation2 + $0x30] sm:$0xff] %vm92_vm0, %v356_v46  ;;  %v357_v54 = vadd.f32 %v870_v51, %v116_v44  ;;  %v306_v55 = vpop.f32.mrb[7].mxu0  ;;  %v436_v56 = vmul.f32 %v404_v45, %v388_v52  ;;  %v1238_v57 = vadd.f32 %v404_v45, %v388_v52  ;;  %v386_v58 = vld [vmem:[#allocation2] sm:$0xff]  ;;  %v413_v45 = vld [vmem:[#allocation8 + $0x58] sm:$0xff] }
 0x15b   :  { %371 = vst.msk [vmem:[#allocation2 + $0x20] sm:$0xff] %vm92_vm0, %v354_v50  ;;  %v355_v60 = vadd.f32 %v306_v55, %v114_v48  ;;  %v434_v61 = vmul.f32 %v402_v49, %v386_v58  ;;  %v1241_v62 = vadd.f32 %v402_v49, %v386_v58  ;;  %v389_v63 = vld [vmem:[#allocation2 + $0x18] sm:$0xff]  ;;  %v411_v49 = vld [vmem:[#allocation8 + $0x48] sm:$0xff] }
 0x15c   :  { %374 = vst.msk [vmem:[#allocation2 + $0x38] sm:$0xff] %vm92_vm0, %v357_v54  ;;  %470 = vrot.lane.b32.xlu1 %v436_v56, %s1113_s4  ;;  %v1245_v0 = vadd.f32 %v405_v53, %v389_v63  ;;  %v387_v1 = vld [vmem:[#allocation2 + $0x8] sm:$0xff]  ;;  %v437_v5 = vmul.f32 %v405_v53, %v389_v63  ;;  %v414_v63 = vld [vmem:[#allocation8 + $0x60] sm:$0xff] }
 0x15d   :  { %372 = vst.msk [vmem:[#allocation2 + $0x28] sm:$0xff] %vm92_vm0, %v355_v60  ;;  %466 = vrot.lane.b32.xlu0 %v434_v61, %s1113_s4  ;;  %v1249_v3 = vadd.f32 %v403_v59, %v387_v1  ;;  %v435_v8 = vmul.f32 %v403_v59, %v387_v1  ;;  %v416_v61 = vld [vmem:[#allocation8 + $0x70] sm:$0xff] }
 0x15f   :  { %v873_v6 = vpop.f32.mrb[8].mxu0 }
 0x160   :  { %v360_v10 = vadd.f32 %v873_v6, %v119_v2  ;;  %v319_v11 = vpop.f32.mrb[9].mxu0  ;;  %472 = vrot.lane.b32.xlu1 %v437_v5, %s1113_s4  ;;  %v415_v6 = vld [vmem:[#allocation8 + $0x68] sm:$0xff] }
 0x161   :  { %v358_v14 = vadd.f32 %v319_v11, %v117_v4  ;;  %v874_v15 = vpop.f32.mrb[10].mxu0  ;;  %468 = vrot.lane.b32.xlu0 %v435_v8, %s1113_s4  ;;  %v392_v16 = vld [vmem:[#allocation2 + $0x30] sm:$0xff]  ;;  %v417_v4 = vld [vmem:[#allocation8 + $0x78] sm:$0xff] }
 0x162   :  { %377 = vst.msk [vmem:[#allocation2 + $0x50] sm:$0xff] %vm92_vm0, %v360_v10  ;;  %v361_v18 = vadd.f32 %v874_v15, %v120_v7  ;;  %v322_v19 = vpop.f32.mrb[11].mxu0  ;;  %v390_v20 = vld [vmem:[#allocation2 + $0x20] sm:$0xff]  ;;  %v1254_v22 = vadd.f32 %v408_v9, %v392_v16  ;;  %v440_v35 = vmul.f32 %v408_v9, %v392_v16 }
 0x163   :  { %375 = vst.msk [vmem:[#allocation2 + $0x40] sm:$0xff] %vm92_vm0, %v358_v14  ;;  %v359_v23 = vadd.f32 %v322_v19, %v118_v12  ;;  %v1257_v24 = vadd.f32 %v406_v13, %v390_v20  ;;  %v438_v25 = vmul.f32 %v406_v13, %v390_v20  ;;  %v393_v26 = vld [vmem:[#allocation2 + $0x38] sm:$0xff] }
 0x164   :  { %378 = vst.msk [vmem:[#allocation2 + $0x58] sm:$0xff] %vm92_vm0, %v361_v18  ;;  %v391_v27 = vld [vmem:[#allocation2 + $0x28] sm:$0xff]  ;;  %v1260_v28 = vadd.f32 %v409_v17, %v393_v26  ;;  %v441_v43 = vmul.f32 %v409_v17, %v393_v26 }
 0x165   :  { %376 = vst.msk [vmem:[#allocation2 + $0x48] sm:$0xff] %vm92_vm0, %v359_v23  ;;  %474 = vrot.lane.b32.xlu0 %v438_v25, %s1113_s4  ;;  %v1264_v30 = vadd.f32 %v407_v21, %v391_v27  ;;  %v439_v31 = vmul.f32 %v407_v21, %v391_v27 }
 0x167   :  { %v877_v33 = vpop.f32.mrb[12].mxu0  ;;  %476 = vrot.lane.b32.xlu1 %v439_v31, %s1113_s4 }
 0x168   :  { %v364_v37 = vadd.f32 %v877_v33, %v123_v29  ;;  %v335_v38 = vpop.f32.mrb[13].mxu0 }
 0x169   :  { %v362_v41 = vadd.f32 %v335_v38, %v121_v32  ;;  %v878_v42 = vpop.f32.mrb[14].mxu0  ;;  %478 = vrot.lane.b32.xlu0 %v440_v35, %s1113_s4  ;;  %v396_v44 = vld [vmem:[#allocation2 + $0x50] sm:$0xff] }
 0x16a   :  { %381 = vst.msk [vmem:[#allocation2 + $0x70] sm:$0xff] %vm92_vm0, %v364_v37  ;;  %v365_v46 = vadd.f32 %v878_v42, %v124_v34  ;;  %v338_v47 = vpop.f32.mrb[15].mxu0  ;;  %v394_v48 = vld [vmem:[#allocation2 + $0x40] sm:$0xff]  ;;  %v1269_v50 = vadd.f32 %v412_v36, %v396_v44  ;;  %v444_v60 = vmul.f32 %v412_v36, %v396_v44 }
 0x16b   :  { %379 = vst.msk [vmem:[#allocation2 + $0x60] sm:$0xff] %vm92_vm0, %v362_v41  ;;  %v363_v51 = vadd.f32 %v338_v47, %v122_v39  ;;  %480 = vrot.lane.b32.xlu1 %v441_v43, %s1113_s4  ;;  %v426_v52 = vadd.f32 %v410_v40, %v394_v48  ;;  %v442_v53 = vmul.f32 %v410_v40, %v394_v48  ;;  %v397_v54 = vld [vmem:[#allocation2 + $0x58] sm:$0xff] }
 0x16c   :  { %382 = vst.msk [vmem:[#allocation2 + $0x78] sm:$0xff] %vm92_vm0, %v365_v46  ;;  %v395_v55 = vld [vmem:[#allocation2 + $0x48] sm:$0xff]  ;;  %v1274_v56 = vadd.f32 %v413_v45, %v397_v54  ;;  %v445_v1 = vmul.f32 %v413_v45, %v397_v54  ;;  %v790_v45 = vld [vmem:[#allocation11] ss:$0 sm:$0xff] }
 0x16d   :  { %380 = vst.msk [vmem:[#allocation2 + $0x68] sm:$0xff] %vm92_vm0, %v363_v51  ;;  %482 = vrot.lane.b32.xlu0 %v442_v53, %s1113_s4  ;;  %v427_v58 = vadd.f32 %v411_v49, %v395_v55  ;;  %v443_v59 = vmul.f32 %v411_v49, %v395_v55 }
 0x16f   :  { %484 = vrot.lane.b32.xlu1 %v443_v59, %s1113_s4 }
 0x171   :  { %486 = vrot.lane.b32.xlu0 %v444_v60, %s1113_s4  ;;  %v400_v2 = vld [vmem:[#allocation2 + $0x70] sm:$0xff] }
 0x172   :  { %v398_v5 = vld [vmem:[#allocation2 + $0x60] sm:$0xff]  ;;  %v432_v7 = vadd.f32 %v416_v61, %v400_v2  ;;  %v448_v15 = vmul.f32 %v416_v61, %v400_v2 }
 0x173   :  { %488 = vrot.lane.b32.xlu1 %v445_v1, %s1113_s4  ;;  %v430_v8 = vadd.f32 %v414_v63, %v398_v5  ;;  %v446_v9 = vmul.f32 %v414_v63, %v398_v5  ;;  %v401_v10 = vld [vmem:[#allocation2 + $0x78] sm:$0xff] }
 0x174   :  { %v399_v11 = vld [vmem:[#allocation2 + $0x68] sm:$0xff]  ;;  %v433_v12 = vadd.f32 %v417_v4, %v401_v10  ;;  %v449_v16 = vmul.f32 %v417_v4, %v401_v10 }
 0x175   :  { %490 = vrot.lane.b32.xlu0 %v446_v9, %s1113_s4  ;;  %v431_v13 = vadd.f32 %v415_v6, %v399_v11  ;;  %v447_v14 = vmul.f32 %v415_v6, %v399_v11 }
 0x177   :  { %492 = vrot.lane.b32.xlu1 %v447_v14, %s1113_s4 }
 0x179   :  { %494 = vrot.lane.b32.xlu0 %v448_v15, %s1113_s4 }
 0x17b   :  { %496 = vrot.lane.b32.xlu1 %v449_v16, %s1113_s4 }
 0x1ce   :  { %v471_v17 = vpop.permute.xlu1 %470 }
 0x1cf   :  { %v467_v18 = vpop.permute.xlu0 %466  ;;  %v516_v23 = vsel %vm92_vm0, %v1238_v57, %v471_v17 }
 0x1d0   :  { %v514_v19 = vsel %vm92_vm0, %v1241_v62, %v467_v18 }
 0x1d1   :  { %895 = vmatprep.mubr.msk.f32.mxu1 %vm545_vm1, %v514_v19 }
 0x1d2   :  { %v473_v25 = vpop.permute.xlu1 %472 }
 0x1d3   :  { %v469_v20 = vpop.permute.xlu0 %468  ;;  %v517_v27 = vsel %vm92_vm0, %v1245_v0, %v473_v25 }
 0x1d4   :  { %v515_v21 = vsel %vm92_vm0, %v1249_v3, %v469_v20 }
 0x1d5   :  { %896 = vmatmul.mubr.msk.f32.vlgmr.msra.gmra.mrb[0].mxu1 %vm545_vm1, %v515_v21 }
 0x1d6   :  { %898 = vmatprep.mubr.msk.f32.mxu1 %vm545_vm1, %v516_v23 }
 0x1d7   :  { %v475_v26 = vpop.permute.xlu0 %474 }
 0x1d8   :  { %v518_v62 = vsel %vm92_vm0, %v1257_v24, %v475_v26 }
 0x1d9   :  { %v477_v29 = vpop.permute.xlu1 %476  ;;  %899 = vmatmul.mubr.msk.f32.gmra.mrb[2].mxu1 %vm545_vm1, %v517_v27 }
 0x1da   :  { %901 = vmatprep.mubr.msk.f32.mxu1 %vm545_vm1, %v518_v62  ;;  %v519_v57 = vsel %vm92_vm0, %v1264_v30, %v477_v29 }
 0x1db   :  { %v479_v3 = vpop.permute.xlu0 %478 }
 0x1dc   :  { %v520_v31 = vsel %vm92_vm0, %v1254_v22, %v479_v3 }
 0x1dd   :  { %v481_v32 = vpop.permute.xlu1 %480  ;;  %902 = vmatmul.mubr.msk.f32.gmra.mrb[4].mxu1 %vm545_vm1, %v519_v57 }
 0x1de   :  { %904 = vmatprep.mubr.msk.f32.mxu1 %vm545_vm1, %v520_v31  ;;  %v521_v24 = vsel %vm92_vm0, %v1260_v28, %v481_v32 }
 0x1df   :  { %v483_v0 = vpop.permute.xlu0 %482 }
 0x1e0   :  { %v522_v33 = vsel %vm92_vm0, %v426_v52, %v483_v0 }
 0x1e1   :  { %v485_v34 = vpop.permute.xlu1 %484  ;;  %905 = vmatmul.mubr.msk.f32.gmra.mrb[6].mxu1 %vm545_vm1, %v521_v24 }
 0x1e2   :  { %907 = vmatprep.mubr.msk.f32.mxu1 %vm545_vm1, %v522_v33  ;;  %v523_v35 = vsel %vm92_vm0, %v427_v58, %v485_v34 }
 0x1e3   :  { %v487_v30 = vpop.permute.xlu0 %486 }
 0x1e4   :  { %v524_v22 = vsel %vm92_vm0, %v1269_v50, %v487_v30 }
 0x1e5   :  { %v489_v36 = vpop.permute.xlu1 %488  ;;  %908 = vmatmul.mubr.msk.f32.gmra.mrb[8].mxu1 %vm545_vm1, %v523_v35 }
 0x1e6   :  { %910 = vmatprep.mubr.msk.f32.mxu1 %vm545_vm1, %v524_v22  ;;  %v525_v28 = vsel %vm92_vm0, %v1274_v56, %v489_v36 }
 0x1e7   :  { %v491_v37 = vpop.permute.xlu0 %490 }
 0x1e8   :  { %v526_v38 = vsel %vm92_vm0, %v430_v8, %v491_v37 }
 0x1e9   :  { %v493_v39 = vpop.permute.xlu1 %492  ;;  %911 = vmatmul.mubr.msk.f32.gmra.mrb[10].mxu1 %vm545_vm1, %v525_v28 }
 0x1ea   :  { %913 = vmatprep.mubr.msk.f32.mxu1 %vm545_vm1, %v526_v38  ;;  %v527_v41 = vsel %vm92_vm0, %v431_v13, %v493_v39 }
 0x1eb   :  { %v495_v40 = vpop.permute.xlu0 %494 }
 0x1ec   :  { %v528_v42 = vsel %vm92_vm0, %v432_v7, %v495_v40 }
 0x1ed   :  { %v497_v43 = vpop.permute.xlu1 %496  ;;  %914 = vmatmul.mubr.msk.f32.gmra.mrb[12].mxu1 %vm545_vm1, %v527_v41 }
 0x1ee   :  { %916 = vmatprep.mubr.msk.f32.mxu1 %vm545_vm1, %v528_v42  ;;  %v529_v44 = vsel %vm92_vm0, %v433_v12, %v497_v43 }
 0x1f1   :  { %917 = vmatmul.mubr.msk.f32.gmra.mrb[14].mxu1 %vm545_vm1, %v529_v44 }
 0x2a8   :  { %v897_v46 = vpop.f32.mrb[0].mxu1 }
 0x2a9   :  { %v666_v47 = vadd.f32 %v897_v46, %v790_v45  ;;  %v660_v48 = vpop.f32.mrb[1].mxu1 }
 0x2aa   :  { %v661_v49 = vadd.f32 %v790_v45, %v660_v48 }
 0x2ab   :  { %740 = vst [vmem:[#allocation12 + $0x8] sm:$0xff] %v666_v47 }
 0x2ac   :  { %739 = vst [vmem:[#allocation12] sm:$0xff] %v661_v49  ;;  %v900_v50 = vpop.f32.mrb[2].mxu1 }
 0x2ad   :  { %v676_v51 = vadd.f32 %v900_v50, %v790_v45  ;;  %v670_v52 = vpop.f32.mrb[3].mxu1 }
 0x2ae   :  { %v671_v53 = vadd.f32 %v790_v45, %v670_v52 }
 0x2af   :  { %742 = vst [vmem:[#allocation12 + $0x18] sm:$0xff] %v676_v51 }
 0x2b0   :  { %741 = vst [vmem:[#allocation12 + $0x10] sm:$0xff] %v671_v53  ;;  %v903_v54 = vpop.f32.mrb[4].mxu1 }
 0x2b1   :  { %v686_v55 = vadd.f32 %v903_v54, %v790_v45  ;;  %v680_v56 = vpop.f32.mrb[5].mxu1 }
 0x2b2   :  { %v681_v58 = vadd.f32 %v790_v45, %v680_v56 }
 0x2b3   :  { %744 = vst [vmem:[#allocation12 + $0x28] sm:$0xff] %v686_v55 }
 0x2b4   :  { %743 = vst [vmem:[#allocation12 + $0x20] sm:$0xff] %v681_v58  ;;  %v906_v59 = vpop.f32.mrb[6].mxu1 }
 0x2b5   :  { %v696_v60 = vadd.f32 %v906_v59, %v790_v45  ;;  %v690_v61 = vpop.f32.mrb[7].mxu1 }
 0x2b6   :  { %v691_v63 = vadd.f32 %v790_v45, %v690_v61 }
 0x2b7   :  { %746 = vst [vmem:[#allocation12 + $0x38] sm:$0xff] %v696_v60 }
 0x2b8   :  { %745 = vst [vmem:[#allocation12 + $0x30] sm:$0xff] %v691_v63  ;;  %v909_v1 = vpop.f32.mrb[8].mxu1 }
 0x2b9   :  { %v706_v2 = vadd.f32 %v909_v1, %v790_v45  ;;  %v700_v4 = vpop.f32.mrb[9].mxu1 }
 0x2ba   :  { %v701_v5 = vadd.f32 %v790_v45, %v700_v4 }
 0x2bb   :  { %748 = vst [vmem:[#allocation12 + $0x48] sm:$0xff] %v706_v2 }
 0x2bc   :  { %747 = vst [vmem:[#allocation12 + $0x40] sm:$0xff] %v701_v5  ;;  %v912_v6 = vpop.f32.mrb[10].mxu1 }
 0x2bd   :  { %v716_v7 = vadd.f32 %v912_v6, %v790_v45  ;;  %v710_v8 = vpop.f32.mrb[11].mxu1 }
 0x2be   :  { %v711_v9 = vadd.f32 %v790_v45, %v710_v8 }
 0x2bf   :  { %750 = vst [vmem:[#allocation12 + $0x58] sm:$0xff] %v716_v7 }
 0x2c0   :  { %749 = vst [vmem:[#allocation12 + $0x50] sm:$0xff] %v711_v9  ;;  %v915_v10 = vpop.f32.mrb[12].mxu1 }
 0x2c1   :  { %v726_v11 = vadd.f32 %v915_v10, %v790_v45  ;;  %v720_v12 = vpop.f32.mrb[13].mxu1 }
 0x2c2   :  { %v721_v13 = vadd.f32 %v790_v45, %v720_v12 }
 0x2c3   :  { %752 = vst [vmem:[#allocation12 + $0x68] sm:$0xff] %v726_v11 }
 0x2c4   :  { %751 = vst [vmem:[#allocation12 + $0x60] sm:$0xff] %v721_v13  ;;  %v918_v14 = vpop.f32.mrb[14].mxu1 }
 0x2c5   :  { %v736_v15 = vadd.f32 %v918_v14, %v790_v45  ;;  %v730_v16 = vpop.f32.mrb[15].mxu1 }
 0x2c6   :  { %v731_v17 = vadd.f32 %v790_v45, %v730_v16 }
 0x2c7   :  { %754 = vst [vmem:[#allocation12 + $0x78] sm:$0xff] %v736_v15 }
 0x2c8   :  { %753 = vst [vmem:[#allocation12 + $0x70] sm:$0xff] %v731_v17 }
 0x2c9   :  { %1084 = shalt.err (!%p1081_p2)
}
 0x2ca   :  { %s1085_s12 = scalar_lea.hbm %s1347_s5, 2048 }
 0x2cb   :  { %p1086_p3 = scmp.ne.s32.totalorder %s1347_s5, %s1085_s12  ;;  %p1089_p4 = scmp.lt.u32.totalorder %s1085_s12, %s1347_s5 }
 0x2cd   :  { %p1091_p5 = pnand %p1089_p4, %p1086_p3 }
 0x2cf   :  { %1094 = shalt.err (!%p1091_p5)
}
 0x2d0   :  { %766 = dma.vmem_to_hbm [thread:$0]  %s761_s7, 2048, %s1347_s5, [#allocation5], %s1108_s18, %s1108_s18, %s1109_s19  }
 0x2d1   :  { %1101 = dma.done.wait [#allocation5], 2048  }
 0x2d2   :  { %1102 = vsyncadd [#allocation5], 4294965248 }
 0x2d3   :  { %770 = vsyncpa [#allocation4], 1 }
 0x2d4   :  { %771 = vsyncpa [#allocation7], 1 }
 0x2d5   :  { %772 = vsyncpa [#allocation10], 1 }
 0x2d6   :  { %773 = vsyncpa [#allocation5], 1 }

</bundles_post_ra>
